<compile_context>
chip_gen: v7x
topology: tpu7x:2x2x1
jax: 0.10.0
libtpu: 0.0.40
codegen_flags: <defaults>
</compile_context>

<pallas_src>
import functools

import jax
import jax.numpy as jnp
from jax import lax
from jax.experimental import pallas as pl
from jax.experimental.pallas import tpu as pltpu


def _lstm_kernel(x_ref, w_ih_t_ref, w_hh_t_ref, b_ref, post_a_ref, post_b_ref,
                 y_ref, *, seq_len, batch):
    # x_ref:      (S*N, I)   flattened input sequence (seq-major, then batch)
    # w_ih_t_ref: (I, 4H)    input->gate weights, transposed, PRE-SCALED per lane
    # w_hh_t_ref: (H, 4H)    hidden->gate weights, transposed, PRE-SCALED per lane
    # b_ref:      (1, 4H)    fused bias (b_ih + b_hh), PRE-SCALED per lane
    # post_*_ref: (1, 4H)    post-tanh affine (sigmoid lanes: 0.5*t+0.5; g lanes: t)
    # y_ref:      (S*N, H)   per-step hidden states, flattened like x
    # Gate order along the 4H axis is PyTorch's [i, f, g, o].
    S, N = seq_len, batch
    SN, I = x_ref.shape
    H = w_hh_t_ref.shape[0]
    G = 4 * H

    w_ih_t = w_ih_t_ref[...]                                   # (I, 4H)
    w_hh_t = w_hh_t_ref[...]                                   # (H, 4H)
    x = x_ref[...]                                             # (S*N, I)

    # ---- Hoisted broadcasts (computed once; JAX does not CSE broadcast_in_dim).
    b_full = jnp.broadcast_to(b_ref[...], (SN, G))             # (S*N, 4H)
    post_a = jnp.broadcast_to(post_a_ref[...], (N, G))         # (N, 4H)
    post_b = jnp.broadcast_to(post_b_ref[...], (N, G))         # (N, 4H)
    w_hh_rows = [jnp.broadcast_to(w_hh_t[k:k + 1, :], (N, G)) for k in range(H)]

    # ---- Input-dependent gate pre-activations for ALL timesteps at once
    # (no loop-carried dependence): gates_x = x @ W_ih^T + b as VPU FMAs.
    gates_x = b_full
    for k in range(I):
        gates_x = gates_x + x[:, k:k + 1] * w_ih_t[k:k + 1, :]

    # ---- Serial recurrence, fully unrolled with static slices.
    h = jnp.zeros((N, H), jnp.float32)
    c = jnp.zeros((N, H), jnp.float32)
    outs = []
    for t in range(S):
        # h @ W_hh^T as H broadcast multiply-adds on the VPU (no MXU latency).
        # The lane-broadcast of h[:, k] is genuinely data-dependent and stays
        # on the critical path; the W_hh row broadcasts were hoisted above.
        hw = h[:, 0:1] * w_hh_rows[0]
        for k in range(1, H):
            hw = hw + h[:, k:k + 1] * w_hh_rows[k]
        gates = gates_x[t * N:(t + 1) * N, :] + hw             # (N, 4H), pre-scaled

        # Single EUP push for all four gates: weights/bias carry the 0.5
        # sigmoid pre-scale, so sigmoid(z) = 0.5*tanh(0.5*z)+0.5 becomes one
        # tanh followed by one hoisted-constant FMA.
        act = jnp.tanh(gates) * post_a + post_b                # (N, 4H)
        i_g = act[:, 0:H]
        f_g = act[:, H:2 * H]
        g_g = act[:, 2 * H:3 * H]
        o_g = act[:, 3 * H:4 * H]

        c = f_g * c + i_g * g_g
        h = o_g * jnp.tanh(c)
        outs.append(h)

    # One store at the end (no per-step masked partial stores).
    y_ref[...] = jnp.concatenate(outs, axis=0).astype(y_ref.dtype)


def prepare_lstm_params(w_ih, w_hh, b_ih, b_hh):
    """One-time conversion of PyTorch-layout LSTM params to the kernel layout.

    Called once at init time (NOT per forward call): fuses the biases,
    transposes the weights, and folds the 0.5 sigmoid pre-scale of
    sigmoid(z) = 0.5*tanh(0.5*z)+0.5 into the weights/bias per output lane
    (PyTorch gate order [i, f, g, o]: sigmoid on i/f/o lanes, tanh on g lanes).
    """
    H = w_hh.shape[1]
    G = 4 * H
    half = jnp.full((H,), 0.5, jnp.float32)
    one = jnp.ones((H,), jnp.float32)
    zero = jnp.zeros((H,), jnp.float32)
    scale = jnp.concatenate([half, half, one, half])            # (4H,) pre-scale
    post_a = scale.reshape(1, G)                                # 0.5 on sigmoid lanes
    post_b = jnp.concatenate([half, half, zero, half]).reshape(1, G)

    w_ih_t = (w_ih.astype(jnp.float32) * scale[:, None]).T      # (I, 4H)
    w_hh_t = (w_hh.astype(jnp.float32) * scale[:, None]).T      # (H, 4H)
    b = ((b_ih + b_hh).astype(jnp.float32) * scale).reshape(1, G)
    return {"w_ih_t": w_ih_t, "w_hh_t": w_hh_t, "b": b,
            "post_a": post_a, "post_b": post_b}


def model_forward(x1, kparams):
    """x1: (S, 1, N) float32 (seq, input=1, batch). Returns (S, N, H) float32."""
    S, I, N = x1.shape
    # v1 = x1.permute(0, 2, 1): (S, 1, N) -> (S, N, 1). Because the permuted
    # axis has size 1, flattening to (S*N, I) is a zero-copy reshape.
    x_flat = x1.reshape(S * N, I).astype(jnp.float32)
    H = kparams["w_hh_t"].shape[0]

    vmem = pl.BlockSpec(memory_space=pltpu.MemorySpace.VMEM)
    kernel = functools.partial(_lstm_kernel, seq_len=S, batch=N)
    y_flat = pl.pallas_call(
        kernel,
        out_shape=jax.ShapeDtypeStruct((S * N, H), jnp.float32),
        in_specs=[vmem] * 6,
        out_specs=vmem,
    )(x_flat, kparams["w_ih_t"], kparams["w_hh_t"], kparams["b"],
      kparams["post_a"], kparams["post_b"])

    # .detach() == stop_gradient; dropout=0.3 is a no-op for a 1-layer LSTM.
    return lax.stop_gradient(y_flat.reshape(S, N, H))


def init_params(key, input_size=1, hidden_size=2):
    # PyTorch LSTM init: uniform(-1/sqrt(H), 1/sqrt(H)) for all params.
    k = 1.0 / jnp.sqrt(jnp.float32(hidden_size))
    k1, k2, k3, k4 = jax.random.split(key, 4)
    u = lambda kk, shape: jax.random.uniform(kk, shape, jnp.float32, -k, k)
    return {
        "w_ih": u(k1, (4 * hidden_size, input_size)),
        "w_hh": u(k2, (4 * hidden_size, hidden_size)),
        "b_ih": u(k3, (4 * hidden_size,)),
        "b_hh": u(k4, (4 * hidden_size,)),
    }


def lstm_reference(x_sni, w_ih, w_hh, b_ih, b_hh):
    """Plain-JAX reference with PyTorch gate order [i, f, g, o]."""
    S, N, I = x_sni.shape
    H = w_hh.shape[1]
    b = (b_ih + b_hh).reshape(1, 4 * H)

    def step(carry, x_t):
        h, c = carry
        gates = x_t @ w_ih.T + h @ w_hh.T + b
        i_g = jax.nn.sigmoid(gates[:, 0 * H:1 * H])
        f_g = jax.nn.sigmoid(gates[:, 1 * H:2 * H])
        g_g = jnp.tanh(gates[:, 2 * H:3 * H])
        o_g = jax.nn.sigmoid(gates[:, 3 * H:4 * H])
        c_new = f_g * c + i_g * g_g
        h_new = o_g * jnp.tanh(c_new)
        return (h_new, c_new), h_new

    init = (jnp.zeros((N, H), jnp.float32), jnp.zeros((N, H), jnp.float32))
    _, ys = lax.scan(step, init, x_sni)
    return ys


if __name__ == "__main__":
    key = jax.random.PRNGKey(0)
    kx, kp = jax.random.split(key)

    # Shapes consistent with the module: LSTM input_size=1, so x1 is (S, 1, N)
    # and permute(0, 2, 1) yields (S, N, 1) = (seq, batch, input).
    S, N, I, H = 8, 4, 1, 2
    x1 = jax.random.normal(kx, (S, 1, N), jnp.float32)

    raw = init_params(kp, input_size=I, hidden_size=H)
    # One-time param prep (off the per-call hot path).
    kparams = prepare_lstm_params(raw["w_ih"], raw["w_hh"],
                                  raw["b_ih"], raw["b_hh"])

    fwd = jax.jit(model_forward)
    out = jax.block_until_ready(fwd(x1, kparams))
    assert out.shape == (S, N, H), out.shape

    ref = lstm_reference(x1.reshape(S, N, I), raw["w_ih"], raw["w_hh"],
                         raw["b_ih"], raw["b_hh"])
    err = float(jnp.max(jnp.abs(out - ref)))
    assert jnp.allclose(out, ref, atol=2e-5, rtol=2e-5), err
    print("KERNEL_OK")
</pallas_src>

<mosaic_0001>
module attributes {stable_mosaic.version = 11 : i64} {
  func.func @_lstm_kernel(%arg0: memref<32x1xf32, #tpu.memory_space<vmem>>, %arg1: memref<1x8xf32, #tpu.memory_space<vmem>>, %arg2: memref<2x8xf32, #tpu.memory_space<vmem>>, %arg3: memref<1x8xf32, #tpu.memory_space<vmem>>, %arg4: memref<1x8xf32, #tpu.memory_space<vmem>>, %arg5: memref<1x8xf32, #tpu.memory_space<vmem>>, %arg6: memref<32x2xf32, #tpu.memory_space<vmem>>) attributes {dimension_semantics = [], scalar_prefetch = 0 : i64, scratch_operands = 0 : i64, tpu.core_type = #tpu.core_type<tc>} {
    %c0 = arith.constant 0 : index
    %c0_0 = arith.constant 0 : index
    %0 = vector.load %arg1[%c0, %c0_0] : memref<1x8xf32, #tpu.memory_space<vmem>>, vector<1x8xf32>
    %c0_1 = arith.constant 0 : index
    %c0_2 = arith.constant 0 : index
    %1 = vector.load %arg2[%c0_1, %c0_2] : memref<2x8xf32, #tpu.memory_space<vmem>>, vector<2x8xf32>
    %c0_3 = arith.constant 0 : index
    %c0_4 = arith.constant 0 : index
    %2 = vector.load %arg0[%c0_3, %c0_4] : memref<32x1xf32, #tpu.memory_space<vmem>>, vector<32x1xf32>
    %c0_5 = arith.constant 0 : index
    %c0_6 = arith.constant 0 : index
    %3 = vector.load %arg3[%c0_5, %c0_6] : memref<1x8xf32, #tpu.memory_space<vmem>>, vector<1x8xf32>
    %4 = vector.shape_cast %3 : vector<1x8xf32> to vector<1x8xf32>
    %5 = vector.broadcast %4 : vector<1x8xf32> to vector<32x8xf32>
    %c0_7 = arith.constant 0 : index
    %c0_8 = arith.constant 0 : index
    %6 = vector.load %arg4[%c0_7, %c0_8] : memref<1x8xf32, #tpu.memory_space<vmem>>, vector<1x8xf32>
    %7 = vector.shape_cast %6 : vector<1x8xf32> to vector<1x8xf32>
    %8 = vector.broadcast %7 : vector<1x8xf32> to vector<4x8xf32>
    %c0_9 = arith.constant 0 : index
    %c0_10 = arith.constant 0 : index
    %9 = vector.load %arg5[%c0_9, %c0_10] : memref<1x8xf32, #tpu.memory_space<vmem>>, vector<1x8xf32>
    %10 = vector.shape_cast %9 : vector<1x8xf32> to vector<1x8xf32>
    %11 = vector.broadcast %10 : vector<1x8xf32> to vector<4x8xf32>
    %12 = vector.extract_strided_slice %1 {offsets = [0, 0], sizes = [1, 8], strides = [1, 1]} : vector<2x8xf32> to vector<1x8xf32>
    %13 = vector.shape_cast %12 : vector<1x8xf32> to vector<1x8xf32>
    %14 = vector.broadcast %13 : vector<1x8xf32> to vector<4x8xf32>
    %15 = vector.extract_strided_slice %1 {offsets = [1, 0], sizes = [1, 8], strides = [1, 1]} : vector<2x8xf32> to vector<1x8xf32>
    %16 = vector.shape_cast %15 : vector<1x8xf32> to vector<1x8xf32>
    %17 = vector.broadcast %16 : vector<1x8xf32> to vector<4x8xf32>
    %18 = vector.broadcast %2 : vector<32x1xf32> to vector<32x8xf32>
    %19 = vector.broadcast %0 : vector<1x8xf32> to vector<32x8xf32>
    %20 = arith.mulf %18, %19 : vector<32x8xf32>
    %21 = arith.addf %5, %20 : vector<32x8xf32>
    %cst = arith.constant 0.000000e+00 : f32
    %22 = vector.broadcast %cst : f32 to vector<4x2xf32>
    %cst_11 = arith.constant 0.000000e+00 : f32
    %23 = vector.broadcast %cst_11 : f32 to vector<4x2xf32>
    %24 = vector.extract_strided_slice %22 {offsets = [0, 0], sizes = [4, 1], strides = [1, 1]} : vector<4x2xf32> to vector<4x1xf32>
    %25 = vector.broadcast %24 : vector<4x1xf32> to vector<4x8xf32>
    %26 = arith.mulf %25, %14 : vector<4x8xf32>
    %27 = vector.extract_strided_slice %22 {offsets = [0, 1], sizes = [4, 1], strides = [1, 1]} : vector<4x2xf32> to vector<4x1xf32>
    %28 = vector.broadcast %27 : vector<4x1xf32> to vector<4x8xf32>
    %29 = arith.mulf %28, %17 : vector<4x8xf32>
    %30 = arith.addf %26, %29 : vector<4x8xf32>
    %31 = vector.extract_strided_slice %21 {offsets = [0, 0], sizes = [4, 8], strides = [1, 1]} : vector<32x8xf32> to vector<4x8xf32>
    %32 = arith.addf %31, %30 : vector<4x8xf32>
    %33 = math.tanh %32 : vector<4x8xf32>
    %34 = arith.mulf %33, %8 : vector<4x8xf32>
    %35 = arith.addf %34, %11 : vector<4x8xf32>
    %36 = vector.extract_strided_slice %35 {offsets = [0, 0], sizes = [4, 2], strides = [1, 1]} : vector<4x8xf32> to vector<4x2xf32>
    %37 = vector.extract_strided_slice %35 {offsets = [0, 2], sizes = [4, 2], strides = [1, 1]} : vector<4x8xf32> to vector<4x2xf32>
    %38 = vector.extract_strided_slice %35 {offsets = [0, 4], sizes = [4, 2], strides = [1, 1]} : vector<4x8xf32> to vector<4x2xf32>
    %39 = vector.extract_strided_slice %35 {offsets = [0, 6], sizes = [4, 2], strides = [1, 1]} : vector<4x8xf32> to vector<4x2xf32>
    %40 = arith.mulf %37, %23 : vector<4x2xf32>
    %41 = arith.mulf %36, %38 : vector<4x2xf32>
    %42 = arith.addf %40, %41 : vector<4x2xf32>
    %43 = math.tanh %42 : vector<4x2xf32>
    %44 = arith.mulf %39, %43 : vector<4x2xf32>
    %45 = vector.extract_strided_slice %44 {offsets = [0, 0], sizes = [4, 1], strides = [1, 1]} : vector<4x2xf32> to vector<4x1xf32>
    %46 = vector.broadcast %45 : vector<4x1xf32> to vector<4x8xf32>
    %47 = arith.mulf %46, %14 : vector<4x8xf32>
    %48 = vector.extract_strided_slice %44 {offsets = [0, 1], sizes = [4, 1], strides = [1, 1]} : vector<4x2xf32> to vector<4x1xf32>
    %49 = vector.broadcast %48 : vector<4x1xf32> to vector<4x8xf32>
    %50 = arith.mulf %49, %17 : vector<4x8xf32>
    %51 = arith.addf %47, %50 : vector<4x8xf32>
    %52 = vector.extract_strided_slice %21 {offsets = [4, 0], sizes = [4, 8], strides = [1, 1]} : vector<32x8xf32> to vector<4x8xf32>
    %53 = arith.addf %52, %51 : vector<4x8xf32>
    %54 = math.tanh %53 : vector<4x8xf32>
    %55 = arith.mulf %54, %8 : vector<4x8xf32>
    %56 = arith.addf %55, %11 : vector<4x8xf32>
    %57 = vector.extract_strided_slice %56 {offsets = [0, 0], sizes = [4, 2], strides = [1, 1]} : vector<4x8xf32> to vector<4x2xf32>
    %58 = vector.extract_strided_slice %56 {offsets = [0, 2], sizes = [4, 2], strides = [1, 1]} : vector<4x8xf32> to vector<4x2xf32>
    %59 = vector.extract_strided_slice %56 {offsets = [0, 4], sizes = [4, 2], strides = [1, 1]} : vector<4x8xf32> to vector<4x2xf32>
    %60 = vector.extract_strided_slice %56 {offsets = [0, 6], sizes = [4, 2], strides = [1, 1]} : vector<4x8xf32> to vector<4x2xf32>
    %61 = arith.mulf %58, %42 : vector<4x2xf32>
    %62 = arith.mulf %57, %59 : vector<4x2xf32>
    %63 = arith.addf %61, %62 : vector<4x2xf32>
    %64 = math.tanh %63 : vector<4x2xf32>
    %65 = arith.mulf %60, %64 : vector<4x2xf32>
    %66 = vector.extract_strided_slice %65 {offsets = [0, 0], sizes = [4, 1], strides = [1, 1]} : vector<4x2xf32> to vector<4x1xf32>
    %67 = vector.broadcast %66 : vector<4x1xf32> to vector<4x8xf32>
    %68 = arith.mulf %67, %14 : vector<4x8xf32>
    %69 = vector.extract_strided_slice %65 {offsets = [0, 1], sizes = [4, 1], strides = [1, 1]} : vector<4x2xf32> to vector<4x1xf32>
    %70 = vector.broadcast %69 : vector<4x1xf32> to vector<4x8xf32>
    %71 = arith.mulf %70, %17 : vector<4x8xf32>
    %72 = arith.addf %68, %71 : vector<4x8xf32>
    %73 = vector.extract_strided_slice %21 {offsets = [8, 0], sizes = [4, 8], strides = [1, 1]} : vector<32x8xf32> to vector<4x8xf32>
    %74 = arith.addf %73, %72 : vector<4x8xf32>
    %75 = math.tanh %74 : vector<4x8xf32>
    %76 = arith.mulf %75, %8 : vector<4x8xf32>
    %77 = arith.addf %76, %11 : vector<4x8xf32>
    %78 = vector.extract_strided_slice %77 {offsets = [0, 0], sizes = [4, 2], strides = [1, 1]} : vector<4x8xf32> to vector<4x2xf32>
    %79 = vector.extract_strided_slice %77 {offsets = [0, 2], sizes = [4, 2], strides = [1, 1]} : vector<4x8xf32> to vector<4x2xf32>
    %80 = vector.extract_strided_slice %77 {offsets = [0, 4], sizes = [4, 2], strides = [1, 1]} : vector<4x8xf32> to vector<4x2xf32>
    %81 = vector.extract_strided_slice %77 {offsets = [0, 6], sizes = [4, 2], strides = [1, 1]} : vector<4x8xf32> to vector<4x2xf32>
    %82 = arith.mulf %79, %63 : vector<4x2xf32>
    %83 = arith.mulf %78, %80 : vector<4x2xf32>
    %84 = arith.addf %82, %83 : vector<4x2xf32>
    %85 = math.tanh %84 : vector<4x2xf32>
    %86 = arith.mulf %81, %85 : vector<4x2xf32>
    %87 = vector.extract_strided_slice %86 {offsets = [0, 0], sizes = [4, 1], strides = [1, 1]} : vector<4x2xf32> to vector<4x1xf32>
    %88 = vector.broadcast %87 : vector<4x1xf32> to vector<4x8xf32>
    %89 = arith.mulf %88, %14 : vector<4x8xf32>
    %90 = vector.extract_strided_slice %86 {offsets = [0, 1], sizes = [4, 1], strides = [1, 1]} : vector<4x2xf32> to vector<4x1xf32>
    %91 = vector.broadcast %90 : vector<4x1xf32> to vector<4x8xf32>
    %92 = arith.mulf %91, %17 : vector<4x8xf32>
    %93 = arith.addf %89, %92 : vector<4x8xf32>
    %94 = vector.extract_strided_slice %21 {offsets = [12, 0], sizes = [4, 8], strides = [1, 1]} : vector<32x8xf32> to vector<4x8xf32>
    %95 = arith.addf %94, %93 : vector<4x8xf32>
    %96 = math.tanh %95 : vector<4x8xf32>
    %97 = arith.mulf %96, %8 : vector<4x8xf32>
    %98 = arith.addf %97, %11 : vector<4x8xf32>
    %99 = vector.extract_strided_slice %98 {offsets = [0, 0], sizes = [4, 2], strides = [1, 1]} : vector<4x8xf32> to vector<4x2xf32>
    %100 = vector.extract_strided_slice %98 {offsets = [0, 2], sizes = [4, 2], strides = [1, 1]} : vector<4x8xf32> to vector<4x2xf32>
    %101 = vector.extract_strided_slice %98 {offsets = [0, 4], sizes = [4, 2], strides = [1, 1]} : vector<4x8xf32> to vector<4x2xf32>
    %102 = vector.extract_strided_slice %98 {offsets = [0, 6], sizes = [4, 2], strides = [1, 1]} : vector<4x8xf32> to vector<4x2xf32>
    %103 = arith.mulf %100, %84 : vector<4x2xf32>
    %104 = arith.mulf %99, %101 : vector<4x2xf32>
    %105 = arith.addf %103, %104 : vector<4x2xf32>
    %106 = math.tanh %105 : vector<4x2xf32>
    %107 = arith.mulf %102, %106 : vector<4x2xf32>
    %108 = vector.extract_strided_slice %107 {offsets = [0, 0], sizes = [4, 1], strides = [1, 1]} : vector<4x2xf32> to vector<4x1xf32>
    %109 = vector.broadcast %108 : vector<4x1xf32> to vector<4x8xf32>
    %110 = arith.mulf %109, %14 : vector<4x8xf32>
    %111 = vector.extract_strided_slice %107 {offsets = [0, 1], sizes = [4, 1], strides = [1, 1]} : vector<4x2xf32> to vector<4x1xf32>
    %112 = vector.broadcast %111 : vector<4x1xf32> to vector<4x8xf32>
    %113 = arith.mulf %112, %17 : vector<4x8xf32>
    %114 = arith.addf %110, %113 : vector<4x8xf32>
    %115 = vector.extract_strided_slice %21 {offsets = [16, 0], sizes = [4, 8], strides = [1, 1]} : vector<32x8xf32> to vector<4x8xf32>
    %116 = arith.addf %115, %114 : vector<4x8xf32>
    %117 = math.tanh %116 : vector<4x8xf32>
    %118 = arith.mulf %117, %8 : vector<4x8xf32>
    %119 = arith.addf %118, %11 : vector<4x8xf32>
    %120 = vector.extract_strided_slice %119 {offsets = [0, 0], sizes = [4, 2], strides = [1, 1]} : vector<4x8xf32> to vector<4x2xf32>
    %121 = vector.extract_strided_slice %119 {offsets = [0, 2], sizes = [4, 2], strides = [1, 1]} : vector<4x8xf32> to vector<4x2xf32>
    %122 = vector.extract_strided_slice %119 {offsets = [0, 4], sizes = [4, 2], strides = [1, 1]} : vector<4x8xf32> to vector<4x2xf32>
    %123 = vector.extract_strided_slice %119 {offsets = [0, 6], sizes = [4, 2], strides = [1, 1]} : vector<4x8xf32> to vector<4x2xf32>
    %124 = arith.mulf %121, %105 : vector<4x2xf32>
    %125 = arith.mulf %120, %122 : vector<4x2xf32>
    %126 = arith.addf %124, %125 : vector<4x2xf32>
    %127 = math.tanh %126 : vector<4x2xf32>
    %128 = arith.mulf %123, %127 : vector<4x2xf32>
    %129 = vector.extract_strided_slice %128 {offsets = [0, 0], sizes = [4, 1], strides = [1, 1]} : vector<4x2xf32> to vector<4x1xf32>
    %130 = vector.broadcast %129 : vector<4x1xf32> to vector<4x8xf32>
    %131 = arith.mulf %130, %14 : vector<4x8xf32>
    %132 = vector.extract_strided_slice %128 {offsets = [0, 1], sizes = [4, 1], strides = [1, 1]} : vector<4x2xf32> to vector<4x1xf32>
    %133 = vector.broadcast %132 : vector<4x1xf32> to vector<4x8xf32>
    %134 = arith.mulf %133, %17 : vector<4x8xf32>
    %135 = arith.addf %131, %134 : vector<4x8xf32>
    %136 = vector.extract_strided_slice %21 {offsets = [20, 0], sizes = [4, 8], strides = [1, 1]} : vector<32x8xf32> to vector<4x8xf32>
    %137 = arith.addf %136, %135 : vector<4x8xf32>
    %138 = math.tanh %137 : vector<4x8xf32>
    %139 = arith.mulf %138, %8 : vector<4x8xf32>
    %140 = arith.addf %139, %11 : vector<4x8xf32>
    %141 = vector.extract_strided_slice %140 {offsets = [0, 0], sizes = [4, 2], strides = [1, 1]} : vector<4x8xf32> to vector<4x2xf32>
    %142 = vector.extract_strided_slice %140 {offsets = [0, 2], sizes = [4, 2], strides = [1, 1]} : vector<4x8xf32> to vector<4x2xf32>
    %143 = vector.extract_strided_slice %140 {offsets = [0, 4], sizes = [4, 2], strides = [1, 1]} : vector<4x8xf32> to vector<4x2xf32>
    %144 = vector.extract_strided_slice %140 {offsets = [0, 6], sizes = [4, 2], strides = [1, 1]} : vector<4x8xf32> to vector<4x2xf32>
    %145 = arith.mulf %142, %126 : vector<4x2xf32>
    %146 = arith.mulf %141, %143 : vector<4x2xf32>
    %147 = arith.addf %145, %146 : vector<4x2xf32>
    %148 = math.tanh %147 : vector<4x2xf32>
    %149 = arith.mulf %144, %148 : vector<4x2xf32>
    %150 = vector.extract_strided_slice %149 {offsets = [0, 0], sizes = [4, 1], strides = [1, 1]} : vector<4x2xf32> to vector<4x1xf32>
    %151 = vector.broadcast %150 : vector<4x1xf32> to vector<4x8xf32>
    %152 = arith.mulf %151, %14 : vector<4x8xf32>
    %153 = vector.extract_strided_slice %149 {offsets = [0, 1], sizes = [4, 1], strides = [1, 1]} : vector<4x2xf32> to vector<4x1xf32>
    %154 = vector.broadcast %153 : vector<4x1xf32> to vector<4x8xf32>
    %155 = arith.mulf %154, %17 : vector<4x8xf32>
    %156 = arith.addf %152, %155 : vector<4x8xf32>
    %157 = vector.extract_strided_slice %21 {offsets = [24, 0], sizes = [4, 8], strides = [1, 1]} : vector<32x8xf32> to vector<4x8xf32>
    %158 = arith.addf %157, %156 : vector<4x8xf32>
    %159 = math.tanh %158 : vector<4x8xf32>
    %160 = arith.mulf %159, %8 : vector<4x8xf32>
    %161 = arith.addf %160, %11 : vector<4x8xf32>
    %162 = vector.extract_strided_slice %161 {offsets = [0, 0], sizes = [4, 2], strides = [1, 1]} : vector<4x8xf32> to vector<4x2xf32>
    %163 = vector.extract_strided_slice %161 {offsets = [0, 2], sizes = [4, 2], strides = [1, 1]} : vector<4x8xf32> to vector<4x2xf32>
    %164 = vector.extract_strided_slice %161 {offsets = [0, 4], sizes = [4, 2], strides = [1, 1]} : vector<4x8xf32> to vector<4x2xf32>
    %165 = vector.extract_strided_slice %161 {offsets = [0, 6], sizes = [4, 2], strides = [1, 1]} : vector<4x8xf32> to vector<4x2xf32>
    %166 = arith.mulf %163, %147 : vector<4x2xf32>
    %167 = arith.mulf %162, %164 : vector<4x2xf32>
    %168 = arith.addf %166, %167 : vector<4x2xf32>
    %169 = math.tanh %168 : vector<4x2xf32>
    %170 = arith.mulf %165, %169 : vector<4x2xf32>
    %171 = vector.extract_strided_slice %170 {offsets = [0, 0], sizes = [4, 1], strides = [1, 1]} : vector<4x2xf32> to vector<4x1xf32>
    %172 = vector.broadcast %171 : vector<4x1xf32> to vector<4x8xf32>
    %173 = arith.mulf %172, %14 : vector<4x8xf32>
    %174 = vector.extract_strided_slice %170 {offsets = [0, 1], sizes = [4, 1], strides = [1, 1]} : vector<4x2xf32> to vector<4x1xf32>
    %175 = vector.broadcast %174 : vector<4x1xf32> to vector<4x8xf32>
    %176 = arith.mulf %175, %17 : vector<4x8xf32>
    %177 = arith.addf %173, %176 : vector<4x8xf32>
    %178 = vector.extract_strided_slice %21 {offsets = [28, 0], sizes = [4, 8], strides = [1, 1]} : vector<32x8xf32> to vector<4x8xf32>
    %179 = arith.addf %178, %177 : vector<4x8xf32>
    %180 = math.tanh %179 : vector<4x8xf32>
    %181 = arith.mulf %180, %8 : vector<4x8xf32>
    %182 = arith.addf %181, %11 : vector<4x8xf32>
    %183 = vector.extract_strided_slice %182 {offsets = [0, 0], sizes = [4, 2], strides = [1, 1]} : vector<4x8xf32> to vector<4x2xf32>
    %184 = vector.extract_strided_slice %182 {offsets = [0, 2], sizes = [4, 2], strides = [1, 1]} : vector<4x8xf32> to vector<4x2xf32>
    %185 = vector.extract_strided_slice %182 {offsets = [0, 4], sizes = [4, 2], strides = [1, 1]} : vector<4x8xf32> to vector<4x2xf32>
    %186 = vector.extract_strided_slice %182 {offsets = [0, 6], sizes = [4, 2], strides = [1, 1]} : vector<4x8xf32> to vector<4x2xf32>
    %187 = arith.mulf %184, %168 : vector<4x2xf32>
    %188 = arith.mulf %183, %185 : vector<4x2xf32>
    %189 = arith.addf %187, %188 : vector<4x2xf32>
    %190 = math.tanh %189 : vector<4x2xf32>
    %191 = arith.mulf %186, %190 : vector<4x2xf32>
    %192 = tpu.concatenate %44, %65, %86, %107, %128, %149, %170, %191 in 0 : vector<4x2xf32>, vector<4x2xf32>, vector<4x2xf32>, vector<4x2xf32>, vector<4x2xf32>, vector<4x2xf32>, vector<4x2xf32>, vector<4x2xf32> -> vector<32x2xf32>
    %c0_12 = arith.constant 0 : index
    %c0_13 = arith.constant 0 : index
    %193 = vector.load %arg6[%c0_12, %c0_13] : memref<32x2xf32, #tpu.memory_space<vmem>>, vector<32x2xf32>
    tpu.vector_store %arg6[%c0_12, %c0_13], %192 {strides = array<i32>} : memref<32x2xf32, #tpu.memory_space<vmem>>, vector<32x2xf32>,
    return
  }
}

</mosaic_0001>

<bundles_post_ra>
// kernel: model_forward.1
= control target key start
LH: loop header
LB: loop body
LE: loop exit
PB: predicated region body
PF: predicated region fallthrough
CT: control target
= control target key end

     0   :  { %v475_v0 = vmov 0   ;;  %v50_v2 = vlaneseq  ;;  %s477_s7 = smov 2   ;;  %v478_v28 = vmov 7   ;;  %v479_v29 = vmov 6   ;;  %s678_s0 = inlined_call_operand.vmem [shape: f32[32,1], index: 0, kind: input, shape index: {}]   ;;  %s679_s2 = inlined_call_operand.vmem [shape: f32[2,8], index: 2, kind: input, shape index: {}]   ;;  %s680_s1 = inlined_call_operand.vmem [shape: f32[1,8], index: 1, kind: input, shape index: {}]   ;;  %s681_s3 = inlined_call_operand.vmem [shape: f32[1,8], index: 3, kind: input, shape index: {}]   ;;  %s682_s4 = inlined_call_operand.vmem [shape: f32[1,8], index: 4, kind: input, shape index: {}]   ;;  %s683_s5 = inlined_call_operand.vmem [shape: f32[1,8], index: 5, kind: input, shape index: {}]   ;;  %s684_s6 = inlined_call_operand.vmem [shape: f32[32,2], index: 6, kind: output, shape index: {}]  }
   0x1   :  { %430 = vset.pattern.permute.xlu0 %v475_v0  ;;  %v25_v1 = vld [vmem:[%s678_s0] sm:$0xff]  ;;  %432 = vset.pattern.permute.xlu1 %v478_v28  ;;  %v26_v52 = vld [vmem:[%s678_s0 + $0x8] sm:$0xff]  ;;  %vm389_vm0 = vcmask 1043456   ;;  %vm410_vm1 = vcmask 15360  }
   0x2   :  { %60 = vperm.xlu0 %430, %v25_v1   ;;  %v51_v3 = vshrl.u32 %v50_v2, 7  ;;  %v24_v6 = vld [vmem:[%s679_s2] sm:$0x3] }
   0x3   :  { %v533_v11 = vld [vmem:[%s680_s1] ss:$0 sm:$0xff] }
   0x4   :  { %v52_v4 = vsub.s32 0, %v51_v3  ;;  %v56_v5 = vsub.s32 1, %v51_v3  ;;  %v538_v12 = vld [vmem:[%s681_s3] ss:$0 sm:$0xff]  ;;  %s476_s3 = smov 124  }
   0x5   :  { %v545_v18 = vld [vmem:[%s682_s4] ss:$0 sm:$0xff]  ;;  %s480_s4 = smov 4  }
   0x6   :  { %v524_v7 = vrot.slane %v24_v6, %v52_v4  ;;  %v526_v8 = vrot.slane %v24_v6, %v56_v5  ;;  %v550_v20 = vld [vmem:[%s683_s5] ss:$0 sm:$0xff]  ;;  %431 = vset.pattern.permute.xlu0 %v479_v29 }
   0x8   :  { %v92_v9 = vmul.f32 0.0, %v524_v7  ;;  %v93_v10 = vmul.f32 0.0, %v526_v8 }
   0xa   :  { %v94_v14 = vadd.f32 %v93_v10, %v92_v9 }
  0x81   :  { %v61_v13 = vpop.permute.xlu0 %60 }
  0x82   :  { %v84_v15 = vmul.f32 %v533_v11, %v61_v13 }
  0x84   :  { %v88_v16 = vadd.f32 %v538_v12, %v84_v15 }
  0x86   :  { %v95_v17 = vadd.f32 %v94_v14, %v88_v16 }
  0x88   :  { %443 = vtanh.f32 %v95_v17 }
  0x92   :  { %v444_v19 = vpop.eup %443 }
  0x93   :  { %v97_v21 = vmul.f32 %v444_v19, %v545_v18 }
  0x95   :  { %v98_v22 = vadd.f32 %v550_v20, %v97_v21 }
  0x97   :  { %101 = vrot.lane.b32.xlu0 %v98_v22, %s476_s3  ;;  %v99_v25 = vmul.f32 0.0, %v98_v22 }
 0x109   :  { %v102_v23 = vpop.permute.xlu0 %101 }
 0x10a   :  { %v104_v24 = vmul.f32 %v102_v23, %v98_v22 }
 0x10c   :  { %106 = vrot.lane.b32.xlu1 %v104_v24, %s477_s7 }
 0x17e   :  { %v107_v26 = vpop.permute.xlu1 %106 }
 0x17f   :  { %v109_v27 = vadd.f32 %v107_v26, %v99_v25 }
 0x181   :  { %445 = vtanh.f32 %v109_v27  ;;  %v136_v45 = vrot.slane %v109_v27, 4 }
 0x18b   :  { %v446_v30 = vpop.eup %445 }
 0x18c   :  { %112 = vrot.lane.b32.xlu1 %v446_v30, %s480_s4 }
 0x1fe   :  { %v113_v31 = vpop.permute.xlu1 %112 }
 0x1ff   :  { %v559_v32 = vmul.f32 %v113_v31, %v98_v22 }
 0x201   :  { %123 = vperm.xlu1 %432, %v559_v32   ;;  %118 = vperm.xlu0 %431, %v559_v32  }
 0x280   :  { %v124_v33 = vpop.permute.xlu1 %123  ;;  %v119_v34 = vpop.permute.xlu0 %118 }
 0x281   :  { %v126_v35 = vmul.f32 %v124_v33, %v526_v8  ;;  %v121_v36 = vmul.f32 %v119_v34, %v524_v7 }
 0x283   :  { %v127_v37 = vadd.f32 %v126_v35, %v121_v36 }
 0x285   :  { %v129_v38 = vrot.slane %v127_v37, 4 }
 0x287   :  { %v131_v39 = vadd.f32 %v129_v38, %v88_v16 }
 0x289   :  { %447 = vtanh.f32 %v131_v39 }
 0x293   :  { %v448_v40 = vpop.eup %447 }
 0x294   :  { %v133_v41 = vmul.f32 %v448_v40, %v545_v18  ;;  %v27_v40 = vld [vmem:[%s678_s0 + $0x10] sm:$0xff] }
 0x296   :  { %v134_v42 = vadd.f32 %v550_v20, %v133_v41 }
 0x298   :  { %140 = vrot.lane.b32.xlu1 %v134_v42, %s476_s3  ;;  %v138_v46 = vmul.f32 %v136_v45, %v134_v42 }
 0x30a   :  { %v141_v43 = vpop.permute.xlu1 %140 }
 0x30b   :  { %v143_v44 = vmul.f32 %v141_v43, %v134_v42 }
 0x30d   :  { %145 = vrot.lane.b32.xlu0 %v143_v44, %s477_s7 }
 0x37f   :  { %v146_v47 = vpop.permute.xlu0 %145 }
 0x380   :  { %v148_v48 = vadd.f32 %v146_v47, %v138_v46 }
 0x382   :  { %449 = vtanh.f32 %v148_v48  ;;  %v175_v5 = vrot.slane %v148_v48, 4 }
 0x38c   :  { %v450_v49 = vpop.eup %449 }
 0x38d   :  { %151 = vrot.lane.b32.xlu1 %v450_v49, %s480_s4 }
 0x3ff   :  { %v152_v50 = vpop.permute.xlu1 %151 }
 0x400   :  { %v570_v51 = vmul.f32 %v152_v50, %v134_v42 }
 0x402   :  { %162 = vperm.xlu1 %432, %v570_v51   ;;  %157 = vperm.xlu0 %431, %v570_v51  }
 0x406   :  { %433 = vset.pattern.permute.xlu0 %v475_v0  ;;  %434 = vset.pattern.permute.xlu1 %v479_v29 }
 0x407   :  { %65 = vperm.xlu0 %433, %v26_v52  }
 0x40b   :  { %435 = vset.pattern.permute.xlu0 %v478_v28 }
 0x481   :  { %v163_v53 = vpop.permute.xlu1 %162  ;;  %v158_v54 = vpop.permute.xlu0 %157 }
 0x482   :  { %v165_v55 = vmul.f32 %v163_v53, %v526_v8  ;;  %v160_v56 = vmul.f32 %v158_v54, %v524_v7 }
 0x484   :  { %v166_v57 = vadd.f32 %v165_v55, %v160_v56 }
 0x486   :  { %v66_v58 = vpop.permute.xlu0 %65  ;;  %v168_v60 = vrot.slane %v166_v57, 4 }
 0x487   :  { %v85_v59 = vmul.f32 %v533_v11, %v66_v58 }
 0x489   :  { %v89_v61 = vadd.f32 %v538_v12, %v85_v59 }
 0x48b   :  { %v170_v62 = vadd.f32 %v168_v60, %v89_v61 }
 0x48d   :  { %451 = vtanh.f32 %v170_v62 }
 0x497   :  { %v452_v63 = vpop.eup %451 }
 0x498   :  { %v172_v1 = vmul.f32 %v452_v63, %v545_v18 }
 0x49a   :  { %v173_v2 = vadd.f32 %v550_v20, %v172_v1 }
 0x49c   :  { %179 = vrot.lane.b32.xlu1 %v173_v2, %s476_s3  ;;  %v177_v6 = vmul.f32 %v175_v5, %v173_v2 }
 0x50e   :  { %v180_v3 = vpop.permute.xlu1 %179 }
 0x50f   :  { %v182_v4 = vmul.f32 %v180_v3, %v173_v2 }
 0x511   :  { %184 = vrot.lane.b32.xlu1 %v182_v4, %s477_s7 }
 0x583   :  { %v185_v9 = vpop.permute.xlu1 %184 }
 0x584   :  { %v187_v10 = vadd.f32 %v185_v9, %v177_v6 }
 0x586   :  { %453 = vtanh.f32 %v187_v10  ;;  %v214_v33 = vrot.slane %v187_v10, 4 }
 0x590   :  { %v454_v13 = vpop.eup %453 }
 0x591   :  { %190 = vrot.lane.b32.xlu0 %v454_v13, %s480_s4 }
 0x603   :  { %v191_v14 = vpop.permute.xlu0 %190 }
 0x604   :  { %v589_v15 = vmul.f32 %v191_v14, %v173_v2 }
 0x606   :  { %201 = vperm.xlu0 %435, %v589_v15   ;;  %196 = vperm.xlu1 %434, %v589_v15  }
 0x685   :  { %v202_v16 = vpop.permute.xlu0 %201  ;;  %v197_v17 = vpop.permute.xlu1 %196 }
 0x686   :  { %v204_v19 = vmul.f32 %v202_v16, %v526_v8  ;;  %v199_v21 = vmul.f32 %v197_v17, %v524_v7 }
 0x688   :  { %v205_v22 = vadd.f32 %v204_v19, %v199_v21 }
 0x68a   :  { %v207_v23 = vrot.slane %v205_v22, 4 }
 0x68c   :  { %v209_v24 = vadd.f32 %v207_v23, %v89_v61 }
 0x68e   :  { %455 = vtanh.f32 %v209_v24 }
 0x698   :  { %v456_v25 = vpop.eup %455 }
 0x699   :  { %v211_v26 = vmul.f32 %v456_v25, %v545_v18 }
 0x69b   :  { %v212_v27 = vadd.f32 %v550_v20, %v211_v26 }
 0x69d   :  { %218 = vrot.lane.b32.xlu1 %v212_v27, %s476_s3  ;;  %v216_v34 = vmul.f32 %v214_v33, %v212_v27 }
 0x70f   :  { %v219_v30 = vpop.permute.xlu1 %218 }
 0x710   :  { %v221_v31 = vmul.f32 %v219_v30, %v212_v27 }
 0x712   :  { %223 = vrot.lane.b32.xlu1 %v221_v31, %s477_s7 }
 0x784   :  { %v224_v35 = vpop.permute.xlu1 %223 }
 0x785   :  { %v226_v36 = vadd.f32 %v224_v35, %v216_v34 }
 0x787   :  { %457 = vtanh.f32 %v226_v36  ;;  %v253_v57 = vrot.slane %v226_v36, 4 }
 0x791   :  { %v458_v37 = vpop.eup %457 }
 0x792   :  { %229 = vrot.lane.b32.xlu0 %v458_v37, %s480_s4 }
 0x804   :  { %v230_v38 = vpop.permute.xlu0 %229 }
 0x805   :  { %v600_v39 = vmul.f32 %v230_v38, %v212_v27  ;;  %v28_v27 = vld [vmem:[%s678_s0 + $0x18] sm:$0xff]  ;;  %s481_s0 = smov 122  }
 0x807   :  { %240 = vperm.xlu0 %435, %v600_v39   ;;  %235 = vperm.xlu1 %434, %v600_v39  }
 0x80b   :  { %436 = vset.pattern.permute.xlu1 %v475_v0 }
 0x80c   :  { %70 = vperm.xlu1 %436, %v27_v40  }
 0x810   :  { %437 = vset.pattern.permute.xlu1 %v479_v29 }
 0x886   :  { %v241_v41 = vpop.permute.xlu0 %240  ;;  %v236_v42 = vpop.permute.xlu1 %235 }
 0x887   :  { %v243_v43 = vmul.f32 %v241_v41, %v526_v8  ;;  %v238_v44 = vmul.f32 %v236_v42, %v524_v7 }
 0x889   :  { %v244_v45 = vadd.f32 %v243_v43, %v238_v44 }
 0x88b   :  { %v71_v46 = vpop.permute.xlu1 %70  ;;  %v246_v48 = vrot.slane %v244_v45, 4 }
 0x88c   :  { %v86_v47 = vmul.f32 %v533_v11, %v71_v46 }
 0x88e   :  { %v90_v49 = vadd.f32 %v538_v12, %v86_v47 }
 0x890   :  { %v248_v50 = vadd.f32 %v246_v48, %v90_v49 }
 0x892   :  { %459 = vtanh.f32 %v248_v50 }
 0x89c   :  { %v460_v52 = vpop.eup %459 }
 0x89d   :  { %v250_v53 = vmul.f32 %v460_v52, %v545_v18 }
 0x89f   :  { %v251_v54 = vadd.f32 %v550_v20, %v250_v53 }
 0x8a1   :  { %257 = vrot.lane.b32.xlu0 %v251_v54, %s476_s3  ;;  %v255_v58 = vmul.f32 %v253_v57, %v251_v54 }
 0x913   :  { %v258_v55 = vpop.permute.xlu0 %257 }
 0x914   :  { %v260_v56 = vmul.f32 %v258_v55, %v251_v54 }
 0x916   :  { %262 = vrot.lane.b32.xlu1 %v260_v56, %s477_s7 }
 0x988   :  { %v263_v59 = vpop.permute.xlu1 %262 }
 0x989   :  { %v265_v60 = vadd.f32 %v263_v59, %v255_v58 }
 0x98b   :  { %461 = vtanh.f32 %v265_v60  ;;  %v292_v19 = vrot.slane %v265_v60, 4 }
 0x995   :  { %v462_v61 = vpop.eup %461 }
 0x996   :  { %268 = vrot.lane.b32.xlu0 %v462_v61, %s480_s4 }
 0xa08   :  { %v269_v62 = vpop.permute.xlu0 %268 }
 0xa09   :  { %v618_v63 = vmul.f32 %v269_v62, %v251_v54 }
 0xa0b   :  { %279 = vperm.xlu0 %435, %v618_v63   ;;  %274 = vperm.xlu1 %437, %v618_v63  }
 0xa0f   :  { %438 = vset.pattern.permute.xlu0 %v479_v29  ;;  %439 = vset.pattern.permute.xlu1 %v478_v28 }
 0xa8a   :  { %v280_v1 = vpop.permute.xlu0 %279  ;;  %v275_v2 = vpop.permute.xlu1 %274 }
 0xa8b   :  { %v282_v3 = vmul.f32 %v280_v1, %v526_v8  ;;  %v277_v4 = vmul.f32 %v275_v2, %v524_v7 }
 0xa8d   :  { %v283_v5 = vadd.f32 %v282_v3, %v277_v4 }
 0xa8f   :  { %v285_v6 = vrot.slane %v283_v5, 4 }
 0xa91   :  { %v287_v9 = vadd.f32 %v285_v6, %v90_v49 }
 0xa93   :  { %463 = vtanh.f32 %v287_v9 }
 0xa9d   :  { %v464_v10 = vpop.eup %463 }
 0xa9e   :  { %v289_v13 = vmul.f32 %v464_v10, %v545_v18 }
 0xaa0   :  { %v290_v14 = vadd.f32 %v550_v20, %v289_v13 }
 0xaa2   :  { %296 = vrot.lane.b32.xlu1 %v290_v14, %s476_s3  ;;  %v294_v21 = vmul.f32 %v292_v19, %v290_v14 }
 0xb14   :  { %v297_v16 = vpop.permute.xlu1 %296 }
 0xb15   :  { %v299_v17 = vmul.f32 %v297_v16, %v290_v14 }
 0xb17   :  { %301 = vrot.lane.b32.xlu0 %v299_v17, %s477_s7 }
 0xb89   :  { %v302_v22 = vpop.permute.xlu0 %301 }
 0xb8a   :  { %v304_v23 = vadd.f32 %v302_v22, %v294_v21 }
 0xb8c   :  { %465 = vtanh.f32 %v304_v23  ;;  %v331_v44 = vrot.slane %v304_v23, 4 }
 0xb96   :  { %v466_v24 = vpop.eup %465 }
 0xb97   :  { %307 = vrot.lane.b32.xlu1 %v466_v24, %s480_s4 }
 0xc09   :  { %v308_v25 = vpop.permute.xlu1 %307 }
 0xc0a   :  { %v310_v26 = vmul.f32 %v308_v25, %v290_v14 }
 0xc0c   :  { %318 = vperm.xlu1 %439, %v310_v26   ;;  %313 = vperm.xlu0 %438, %v310_v26  }
 0xc10   :  { %440 = vset.pattern.permute.xlu1 %v475_v0  ;;  %442 = vset.pattern.permute.xlu0 %v478_v28 }
 0xc11   :  { %75 = vperm.xlu1 %440, %v28_v27  }
 0xc15   :  { %441 = vset.pattern.permute.xlu1 %v479_v29 }
 0xc8b   :  { %v319_v30 = vpop.permute.xlu1 %318  ;;  %v314_v31 = vpop.permute.xlu0 %313 }
 0xc8c   :  { %v321_v33 = vmul.f32 %v319_v30, %v526_v8  ;;  %v316_v34 = vmul.f32 %v314_v31, %v524_v7 }
 0xc8e   :  { %v322_v35 = vadd.f32 %v321_v33, %v316_v34 }
 0xc90   :  { %v76_v36 = vpop.permute.xlu1 %75  ;;  %v324_v38 = vrot.slane %v322_v35, 4 }
 0xc91   :  { %v87_v37 = vmul.f32 %v533_v11, %v76_v36 }
 0xc93   :  { %v91_v40 = vadd.f32 %v538_v12, %v87_v37 }
 0xc95   :  { %v326_v41 = vadd.f32 %v324_v38, %v91_v40 }
 0xc97   :  { %467 = vtanh.f32 %v326_v41 }
 0xca1   :  { %v468_v0 = vpop.eup %467 }
 0xca2   :  { %v328_v28 = vmul.f32 %v468_v0, %v545_v18 }
 0xca4   :  { %v329_v29 = vadd.f32 %v550_v20, %v328_v28 }
 0xca6   :  { %335 = vrot.lane.b32.xlu0 %v329_v29, %s476_s3  ;;  %v333_v45 = vmul.f32 %v331_v44, %v329_v29 }
 0xd18   :  { %v336_v42 = vpop.permute.xlu0 %335 }
 0xd19   :  { %v338_v43 = vmul.f32 %v336_v42, %v329_v29 }
 0xd1b   :  { %340 = vrot.lane.b32.xlu1 %v338_v43, %s477_s7 }
 0xd8d   :  { %v341_v46 = vpop.permute.xlu1 %340 }
 0xd8e   :  { %v343_v11 = vadd.f32 %v341_v46, %v333_v45 }
 0xd90   :  { %469 = vtanh.f32 %v343_v11 }
 0xd9a   :  { %v470_v47 = vpop.eup %469 }
 0xd9b   :  { %346 = vrot.lane.b32.xlu0 %v470_v47, %s480_s4 }
 0xe0d   :  { %v347_v12 = vpop.permute.xlu0 %346 }
 0xe0e   :  { %v349_v48 = vmul.f32 %v347_v12, %v329_v29 }
 0xe10   :  { %357 = vperm.xlu0 %442, %v349_v48   ;;  %352 = vperm.xlu1 %441, %v349_v48  }
 0xe8f   :  { %v358_v49 = vpop.permute.xlu0 %357  ;;  %v353_v50 = vpop.permute.xlu1 %352 }
 0xe90   :  { %v360_v52 = vmul.f32 %v358_v49, %v526_v8  ;;  %v355_v53 = vmul.f32 %v353_v50, %v524_v7  ;;  %v390_v7 = vsel %vm389_vm0, %v559_v32, %v570_v51  ;;  %v392_v8 = vsel %vm389_vm0, %v618_v63, %v310_v26 }
 0xe91   :  { %v391_v51 = vsel %vm389_vm0, %v589_v15, %v600_v39 }
 0xe92   :  { %v361_v54 = vadd.f32 %v360_v52, %v355_v53 }
 0xe94   :  { %v363_v55 = vrot.slane %v361_v54, 4 }
 0xe96   :  { %v365_v56 = vadd.f32 %v363_v55, %v91_v40 }
 0xe98   :  { %471 = vtanh.f32 %v365_v56 }
 0xea2   :  { %v472_v57 = vpop.eup %471 }
 0xea3   :  { %v367_v58 = vmul.f32 %v472_v57, %v545_v18  ;;  %v370_v18 = vrot.slane %v343_v11, 4 }
 0xea5   :  { %v368_v59 = vadd.f32 %v550_v20, %v367_v58 }
 0xea7   :  { %374 = vrot.lane.b32.xlu1 %v368_v59, %s476_s3  ;;  %v372_v62 = vmul.f32 %v370_v18, %v368_v59 }
 0xf19   :  { %v375_v60 = vpop.permute.xlu1 %374 }
 0xf1a   :  { %v377_v61 = vmul.f32 %v375_v60, %v368_v59 }
 0xf1c   :  { %379 = vrot.lane.b32.xlu1 %v377_v61, %s477_s7 }
 0xf20   :  { %398 = vrot.lane.b32.xlu1 %v390_v7, %s481_s0 }
 0xf24   :  { %402 = vrot.lane.b32.xlu1 %v392_v8, %s481_s0 }
 0xf8e   :  { %v380_v20 = vpop.permute.xlu1 %379 }
 0xf8f   :  { %v382_v1 = vadd.f32 %v380_v20, %v372_v62 }
 0xf91   :  { %473 = vtanh.f32 %v382_v1 }
 0xf92   :  { %v399_v2 = vpop.permute.xlu1 %398 }
 0xf93   :  { %411 = vst.msk [vmem:[%s684_s6] sm:$0xff] %vm410_vm1, %v399_v2 }
 0xf96   :  { %v403_v3 = vpop.permute.xlu1 %402 }
 0xf97   :  { %413 = vst.msk [vmem:[%s684_s6 + $0x10] sm:$0xff] %vm410_vm1, %v403_v3 }
 0xf9b   :  { %v474_v32 = vpop.eup %473 }
 0xf9c   :  { %385 = vrot.lane.b32.xlu0 %v474_v32, %s480_s4 }
 0xfa0   :  { %400 = vrot.lane.b32.xlu0 %v391_v51, %s481_s0 }
0x100e   :  { %v386_v63 = vpop.permute.xlu0 %385 }
0x100f   :  { %v388_v4 = vmul.f32 %v386_v63, %v368_v59 }
0x1011   :  { %v393_v5 = vsel %vm389_vm0, %v349_v48, %v388_v4 }
0x1012   :  { %404 = vrot.lane.b32.xlu0 %v393_v5, %s481_s0  ;;  %v401_v6 = vpop.permute.xlu0 %400 }
0x1013   :  { %412 = vst.msk [vmem:[%s684_s6 + $0x8] sm:$0xff] %vm410_vm1, %v401_v6 }
0x1084   :  { %v405_v9 = vpop.permute.xlu0 %404 }
0x1085   :  { %414 = vst.msk [vmem:[%s684_s6 + $0x18] sm:$0xff] %vm410_vm1, %v405_v9 }

</bundles_post_ra>
